<compile_context>
chip_gen: v6e
topology: v6e:2x2x1
jax: 0.10.0
libtpu: 0.0.40
codegen_flags: <defaults>
</compile_context>

<pallas_src>
import functools
import math

import jax
import jax.numpy as jnp
from jax.experimental import pallas as pl
from jax.experimental.pallas import tpu as pltpu


def _scaled_sinu_kernel(x_ref, pos_ref, freq_ref, phase_ref, scale_ref, o_ref):
    # x_ref/o_ref : (b_blk, t_s, D)   activation tile
    # pos_ref     : (t_s, 1)  f32     absolute positions for this seq tile
    # freq_ref    : (1, D)    f32     [inv_freq, inv_freq]
    # phase_ref   : (1, D)    f32     [0,...,0, pi/2,...,pi/2]  (cos x = sin(x+pi/2))
    # scale_ref   : (1, 1)    f32     learned scalar
    angles = pos_ref[...] * freq_ref[...] + phase_ref[...]        # (t_s, D)
    emb = jnp.sin(angles) * scale_ref[...]                        # (t_s, D) f32
    # Broadcast the (t_s, D) embedding across the batch rows of the block; the
    # f32 add is hidden under the HBM stream, output store is lane-dense full-D.
    o_ref[...] = (x_ref[...].astype(jnp.float32) + emb[None, :, :]).astype(o_ref.dtype)


def _plan_tiles(B, S, D, itemsize, budget_bytes):
    """Choose (batch_block, seq_tile) so the per-step working set fits `budget_bytes`."""
    # Sublane packing multiple for the second-to-last block dim (the seq rows).
    sub = {4: 8, 2: 16, 1: 32}.get(itemsize, 8)
    # Per (batch, seq) row of the block: x + out, double-buffered (4 * itemsize),
    # plus ~3 full-tile f32 temporaries (angles / emb / f32 add) — conservative.
    row_bytes = D * (4 * itemsize + 16)
    max_rows = max(sub, budget_bytes // row_bytes)

    if max_rows >= B * min(S, sub):
        # Fold the whole batch into the block: one grid step covers all B rows
        # of a seq tile, so the sinusoid build is fully amortized over batch.
        b_blk = B
        t_s = min(S, max(sub, (max_rows // B) // sub * sub))
    else:
        # Large B * D: fall back to per-batch blocks.
        b_blk = 1
        t_s = min(S, max(sub, (max_rows // sub) * sub))

    # Megacore (v7x has 2 TensorCores sharding the "parallel" axes): make sure
    # the sequence axis has >= 2 tiles whenever it can be split on a sublane
    # boundary.  Costs one extra ~0.35us grid step on 1-TC chips, negligible.
    if t_s == S and S >= 2 * sub:
        t_s = min(S, (((S + 1) // 2) + sub - 1) // sub * sub)
    return b_blk, t_s


@functools.partial(jax.jit, static_argnames=("vmem_budget_bytes", "donate_x"))
def scaled_sinusoidal_embedding(x, inv_freq, scale, *,
                                vmem_budget_bytes=12 * 1024 * 1024,
                                donate_x=False):
    """x: (B, S, D); inv_freq: (D//2,); scale: scalar or (1,). Returns x + emb*scale."""
    B, S, D = x.shape
    half = inv_freq.shape[0]
    assert half * 2 == D, "ScaledSinusoidalEmbedding requires an even dim"

    itemsize = jnp.dtype(x.dtype).itemsize
    b_blk, t_s = _plan_tiles(B, S, D, itemsize, vmem_budget_bytes)
    num_b = pl.cdiv(B, b_blk)
    num_s = pl.cdiv(S, t_s)

    # Tiny side inputs (read bytes are ~1/D of the x stream — negligible).
    pos = jnp.arange(S, dtype=jnp.float32).reshape(S, 1)
    freq_full = jnp.concatenate([inv_freq, inv_freq]).astype(jnp.float32).reshape(1, D)
    phase = jnp.concatenate([
        jnp.zeros((half,), jnp.float32),
        jnp.full((half,), math.pi / 2, jnp.float32),
    ]).reshape(1, D)
    scale2d = jnp.asarray(scale, jnp.float32).reshape(1, 1)

    extra = {}
    if donate_x:
        # Output is x-shaped; reuse x's HBM buffer when the caller donates it.
        extra["input_output_aliases"] = {0: 0}

    # TODO(synk): for D < 128 a wrapper-side re-layout to a lane-dense (B, S*D)
    # view would avoid masked partial stores; not needed for typical model dims.
    return pl.pallas_call(
        _scaled_sinu_kernel,
        out_shape=jax.ShapeDtypeStruct((B, S, D), x.dtype),
        grid=(num_b, num_s),          # seq innermost -> contiguous HBM streaming
        in_specs=[
            pl.BlockSpec((b_blk, t_s, D), lambda b, s: (b, s, 0)),   # x tile
            pl.BlockSpec((t_s, 1), lambda b, s: (s, 0)),             # positions
            pl.BlockSpec((1, D), lambda b, s: (0, 0)),               # inv_freq x2
            pl.BlockSpec((1, D), lambda b, s: (0, 0)),               # phase
            pl.BlockSpec((1, 1), lambda b, s: (0, 0)),               # scale
        ],
        out_specs=pl.BlockSpec((b_blk, t_s, D), lambda b, s: (b, s, 0)),
        compiler_params=pltpu.CompilerParams(
            dimension_semantics=("parallel", "parallel"),
            vmem_limit_bytes=32 * 1024 * 1024),
        **extra,
    )(x, pos, freq_full, phase, scale2d)


def _reference(x, inv_freq, scale):
    S = x.shape[1]
    t = jnp.arange(S, dtype=jnp.float32)
    sinu = t[:, None] * inv_freq[None, :].astype(jnp.float32)
    emb = jnp.concatenate([jnp.sin(sinu), jnp.cos(sinu)], axis=-1)
    s = jnp.asarray(scale, jnp.float32).reshape(())
    return (x.astype(jnp.float32) + emb[None] * s).astype(x.dtype)


if __name__ == "__main__":
    key = jax.random.PRNGKey(0)
    k1, k2, k3 = jax.random.split(key, 3)

    # Test 1: small shapes consistent with the module (B=2, S=8, D=32), one block.
    B, S, D = 2, 8, 32
    inv_freq = 1.0 / (10000.0 ** (jnp.arange(0, D, 2, dtype=jnp.float32) / D))
    scale = jnp.ones((1,), jnp.float32)          # matches nn.Parameter(torch.ones(1))
    x = jax.random.normal(k1, (B, S, D), dtype=jnp.float32)
    out = jax.block_until_ready(scaled_sinusoidal_embedding(x, inv_freq, scale))
    ref = _reference(x, inv_freq, scale)
    assert out.shape == ref.shape and out.dtype == ref.dtype
    assert jnp.allclose(out, ref, atol=1e-5, rtol=1e-5), float(jnp.max(jnp.abs(out - ref)))

    # Test 2: force the tiled seq + per-batch-block path with a tiny VMEM budget.
    B2, S2, D2 = 2, 64, 128
    inv_freq2 = 1.0 / (10000.0 ** (jnp.arange(0, D2, 2, dtype=jnp.float32) / D2))
    scale2 = 0.5 * jnp.ones((1,), jnp.float32)
    x2 = jax.random.normal(k2, (B2, S2, D2), dtype=jnp.float32)
    out2 = jax.block_until_ready(
        scaled_sinusoidal_embedding(x2, inv_freq2, scale2, vmem_budget_bytes=16 * 1024))
    ref2 = _reference(x2, inv_freq2, scale2)
    assert jnp.allclose(out2, ref2, atol=1e-5, rtol=1e-5), float(jnp.max(jnp.abs(out2 - ref2)))

    # Test 3: bf16 activations, default budget (folded batch, 2 seq tiles).
    x3 = jax.random.normal(k3, (B2, S2, D2), dtype=jnp.float32).astype(jnp.bfloat16)
    out3 = jax.block_until_ready(scaled_sinusoidal_embedding(x3, inv_freq2, scale2))
    ref3 = _reference(x3, inv_freq2, scale2)
    assert jnp.allclose(out3.astype(jnp.float32), ref3.astype(jnp.float32),
                        atol=3e-2, rtol=3e-2)

    print("KERNEL_OK")
</pallas_src>

<mosaic_0001>
module attributes {stable_mosaic.version = 11 : i64} {
  func.func @_scaled_sinu_kernel(%arg0: i32, %arg1: i32, %arg2: memref<2x8x32xf32, #tpu.memory_space<vmem>>, %arg3: memref<8x1xf32, #tpu.memory_space<vmem>>, %arg4: memref<1x32xf32, #tpu.memory_space<vmem>>, %arg5: memref<1x32xf32, #tpu.memory_space<vmem>>, %arg6: memref<1x1xf32, #tpu.memory_space<vmem>>, %arg7: memref<2x8x32xf32, #tpu.memory_space<vmem>>) attributes {dimension_semantics = [#tpu.dimension_semantics<parallel>, #tpu.dimension_semantics<parallel>], iteration_bounds = array<i64: 1, 1>, scalar_prefetch = 0 : i64, scratch_operands = 0 : i64, tpu.core_type = #tpu.core_type<tc>, window_params = [{transform_indices = @transform_0, window_bounds = array<i64: 2, 8, 32>}, {transform_indices = @transform_1, window_bounds = array<i64: 8, 1>}, {pipeline_mode = #tpu.pipeline_mode<synchronous>, transform_indices = @transform_2, window_bounds = array<i64: 1, 32>}, {pipeline_mode = #tpu.pipeline_mode<synchronous>, transform_indices = @transform_3, window_bounds = array<i64: 1, 32>}, {pipeline_mode = #tpu.pipeline_mode<synchronous>, transform_indices = @transform_4, window_bounds = array<i64: 1, 1>}, {transform_indices = @transform_5, window_bounds = array<i64: 2, 8, 32>}]} {
    %c0 = arith.constant 0 : index
    %c0_0 = arith.constant 0 : index
    %0 = vector.load %arg3[%c0, %c0_0] : memref<8x1xf32, #tpu.memory_space<vmem>>, vector<8x1xf32>
    %c0_1 = arith.constant 0 : index
    %c0_2 = arith.constant 0 : index
    %1 = vector.load %arg4[%c0_1, %c0_2] : memref<1x32xf32, #tpu.memory_space<vmem>>, vector<1x32xf32>
    %2 = vector.broadcast %0 : vector<8x1xf32> to vector<8x32xf32>
    %3 = vector.broadcast %1 : vector<1x32xf32> to vector<8x32xf32>
    %4 = arith.mulf %2, %3 : vector<8x32xf32>
    %c0_3 = arith.constant 0 : index
    %c0_4 = arith.constant 0 : index
    %5 = vector.load %arg5[%c0_3, %c0_4] : memref<1x32xf32, #tpu.memory_space<vmem>>, vector<1x32xf32>
    %6 = vector.broadcast %5 : vector<1x32xf32> to vector<8x32xf32>
    %7 = arith.addf %4, %6 : vector<8x32xf32>
    %8 = math.sin %7 : vector<8x32xf32>
    %c0_5 = arith.constant 0 : index
    %c0_6 = arith.constant 0 : index
    %9 = vector.load %arg6[%c0_5, %c0_6] : memref<1x1xf32, #tpu.memory_space<vmem>>, vector<1x1xf32>
    %10 = vector.broadcast %9 : vector<1x1xf32> to vector<8x32xf32>
    %11 = arith.mulf %8, %10 : vector<8x32xf32>
    %c0_7 = arith.constant 0 : index
    %c0_8 = arith.constant 0 : index
    %c0_9 = arith.constant 0 : index
    %12 = vector.load %arg2[%c0_7, %c0_8, %c0_9] : memref<2x8x32xf32, #tpu.memory_space<vmem>>, vector<2x8x32xf32>
    %13 = vector.shape_cast %11 : vector<8x32xf32> to vector<1x8x32xf32>
    %14 = vector.broadcast %13 : vector<1x8x32xf32> to vector<2x8x32xf32>
    %15 = arith.addf %12, %14 : vector<2x8x32xf32>
    %c0_10 = arith.constant 0 : index
    %c0_11 = arith.constant 0 : index
    %c0_12 = arith.constant 0 : index
    %16 = vector.load %arg7[%c0_10, %c0_11, %c0_12] : memref<2x8x32xf32, #tpu.memory_space<vmem>>, vector<2x8x32xf32>
    tpu.vector_store %arg7[%c0_10, %c0_11, %c0_12], %15 {strides = array<i32>} : memref<2x8x32xf32, #tpu.memory_space<vmem>>, vector<2x8x32xf32>,
    return
  }
  func.func @transform_0(%arg0: i32, %arg1: i32) -> (i32, i32, i32) {
    %c0_i32 = arith.constant 0 : i32
    %c0_i32_0 = arith.constant 0 : i32
    return %arg0, %arg1, %c0_i32 : i32, i32, i32
  }
  func.func @transform_1(%arg0: i32, %arg1: i32) -> (i32, i32) {
    %c0_i32 = arith.constant 0 : i32
    %c0_i32_0 = arith.constant 0 : i32
    return %arg1, %c0_i32 : i32, i32
  }
  func.func @transform_2(%arg0: i32, %arg1: i32) -> (i32, i32) {
    %c0_i32 = arith.constant 0 : i32
    %c0_i32_0 = arith.constant 0 : i32
    %c0_i32_1 = arith.constant 0 : i32
    return %c0_i32, %c0_i32_0 : i32, i32
  }
  func.func @transform_3(%arg0: i32, %arg1: i32) -> (i32, i32) {
    %c0_i32 = arith.constant 0 : i32
    %c0_i32_0 = arith.constant 0 : i32
    %c0_i32_1 = arith.constant 0 : i32
    return %c0_i32, %c0_i32_0 : i32, i32
  }
  func.func @transform_4(%arg0: i32, %arg1: i32) -> (i32, i32) {
    %c0_i32 = arith.constant 0 : i32
    %c0_i32_0 = arith.constant 0 : i32
    %c0_i32_1 = arith.constant 0 : i32
    return %c0_i32, %c0_i32_0 : i32, i32
  }
  func.func @transform_5(%arg0: i32, %arg1: i32) -> (i32, i32, i32) {
    %c0_i32 = arith.constant 0 : i32
    %c0_i32_0 = arith.constant 0 : i32
    return %arg0, %arg1, %c0_i32 : i32, i32, i32
  }
}

</mosaic_0001>

<bundles_post_ra>
// kernel: scaled_sinusoidal_embedding.1
= control target key start
LH: loop header
LB: loop body
LE: loop exit
PB: predicated region body
PF: predicated region fallthrough
CT: control target
= control target key end

     0   :  { %s355_s0 = inlined_call_operand.hbm [shape: f32[2,8,32], index: 0, kind: input, shape index: {}]   ;;  %s356_s1 = inlined_call_operand.vmem [shape: f32[8,1], index: 1, kind: input, shape index: {}]   ;;  %s357_s2 = inlined_call_operand.vmem [shape: f32[1,32], index: 2, kind: input, shape index: {}]   ;;  %s358_s3 = inlined_call_operand.vmem [shape: f32[1,32], index: 3, kind: input, shape index: {}]   ;;  %s359_s4 = inlined_call_operand.<no memory space> [shape: f32[1,1], index: 4, kind: input, shape index: {}]   ;;  %s360_s5 = inlined_call_operand.hbm [shape: f32[2,8,32], index: 5, kind: output, shape index: {}]  }
   0x1   :  { %v10_v0 = vstv %s359_s4 }
   0x2   :  { %11 = vst [vmem:[#allocation2] sm:$0x1] %v10_v0 }
   0x3   :  { %12 = vsyncpa [#allocation4], 0 }
   0x4   :  { %13 = vsyncpa [#allocation5], 0  ;;  %s269_s20 = smov [#allocation3]  }
   0x5   :  { %s19_s21 = sshll.u32 %s269_s20, 4  ;;  %s20_s21 = int_to_ptr.vmem [resolvable:$true] %s19_s21 }
   0x6   :  { %s233_s22 = scalar_lea.vmem %s20_s21, 256  ;;  %p238_p1 = scmp.lt.s32.totalorder %s20_s21, %s20_s21 }
   0x7   :  { %p234_p0 = scmp.ne.s32.totalorder %s20_s21, %s233_s22  ;;  %p239_p2 = scmp.lt.s32.totalorder %s233_s22, %s233_s22 }
   0x9   :  { %p240_p3 = por %p239_p2, %p238_p1 }
   0xb   :  { %p241_p4 = pnand %p240_p3, %p234_p0 }
   0xd   :  { %244 = shalt.err (!%p241_p4)
}
   0xe   :  { %s270_s23 = smov 128   ;;  %s271_s24 = smov 8  }
   0xf   :  { %25 = dma.hbm_to_vmem [thread:$0]  %s355_s0, 256, %s20_s21, [#allocation4], %s270_s23, %s270_s23, %s271_s24  }
  0x10   :  { %265 = dma.done.wait [#allocation4], 256  }
  0x11   :  { %266 = vsyncadd [#allocation4], 4294967040  ;;  %v272_v1 = vmov 0   ;;  %v37_v2 = vld [vmem:[%s356_s1] sm:$0xff]  ;;  %v273_v20 = vmov 2102212464  }
  0x12   :  { %220 = vset.pattern.permute.xlu0 %v272_v1  ;;  %v204_v3 = vld [vmem:[#allocation2] ss:$0 sm:$0xff]  ;;  %v274_v22 = vmov 920167782   ;;  %v275_v26 = vmov 1326507024  }
  0x13   :  { %41 = vperm.xlu0 %220, %v37_v2   ;;  %v198_v4 = vld [vmem:[%s357_s2] ss:$0 sm:$0xff]  ;;  %v276_v28 = vmov 683565275   ;;  %v277_v30 = vmov 2475754826  }
  0x14   :  { %v199_v5 = vld [vmem:[%s358_s3] ss:$0 sm:$0xff]  ;;  %v278_v33 = vmov 2131351028   ;;  %s279_s0 = smov [#allocation6]   ;;  %vm178_vm13 = vcmask 261120  }
  0x15   :  { %s186_s1 = sshll.u32 %s279_s0, 4  ;;  %s187_s1 = int_to_ptr.vmem [resolvable:$true] %s186_s1 }
  0x16   :  { %s245_s2 = scalar_lea.vmem %s187_s1, 256  ;;  %p250_p6 = scmp.lt.s32.totalorder %s187_s1, %s187_s1 }
  0x17   :  { %170 = vperm.xlu0 %220, %v204_v3   ;;  %p246_p5 = scmp.ne.s32.totalorder %s187_s1, %s245_s2  ;;  %p251_p7 = scmp.lt.s32.totalorder %s245_s2, %s245_s2 }
  0x19   :  { %p252_p8 = por %p251_p7, %p250_p6 }
  0x1b   :  { %p253_p9 = pnand %p252_p8, %p246_p5 }
  0x8e   :  { %v42_v6 = vpop.permute.xlu0 %41 }
  0x8f   :  { %v50_v7 = vmul.f32 %v198_v4, %v42_v6 }
  0x91   :  { %v328_v8 = vadd.f32 %v199_v5, %v50_v7 }
  0x93   :  { %v62_v9 = vand.u32 2139095040, %v328_v8  ;;  %v59_v10 = vand.u32 2147483647, %v328_v8  ;;  %vm61_vm7 = vcmp.lt.s32.totalorder %v328_v8, 0  ;;  %vm151_vm12 = vweird.f32 %v328_v8 }
  0x95   :  { %v63_v11 = vshrl.u32 %v62_v9, 23  ;;  %v66_v13 = vand.u32 8388607, %v59_v10  ;;  %vm60_vm8 = vcmp.le.f32.partialorder %v59_v10, 0.7853982 }
  0x97   :  { %v200_v12 = vadd.s32 4294967169, %v63_v11  ;;  %v67_v16 = vor.u32 8388608, %v66_v13 }
  0x99   :  { %v69_v14 = vadd.s32 1, %v200_v12  ;;  %v107_v24 = vshll.u32 %v67_v16, 8 }
  0x9b   :  { %vm70_vm0 = vcmp.gt.s32.totalorder %v69_v14, 0 }
  0x9c   :  { %v71_v15 = vsel %vm70_vm0, %v69_v14, 0 }
  0x9d   :  { %v73_v17 = vand.u32 31, %v71_v15  ;;  %v72_v18 = vshrl.u32 %v71_v15, 5 }
  0x9f   :  { %v74_v19 = vsub.s32 32, %v73_v17  ;;  %v85_v21 = vshll.u32 %v273_v20, %v73_v17  ;;  %v88_v23 = vshll.u32 %v274_v22, %v73_v17  ;;  %v76_v29 = vshll.u32 %v276_v28, %v73_v17 }
  0xa0   :  { %v79_v32 = vshll.u32 %v277_v30, %v73_v17  ;;  %v82_v35 = vshll.u32 %v278_v33, %v73_v17  ;;  %vm94_vm1 = vcmp.lt.s32.totalorder %v72_v18, 4  ;;  %vm91_vm2 = vcmp.lt.s32.totalorder %v72_v18, 1 }
  0xa1   :  { %v86_v25 = vshrl.u32 %v274_v22, %v74_v19  ;;  %v89_v27 = vshrl.u32 %v275_v26, %v74_v19  ;;  %v77_v31 = vshrl.u32 %v277_v30, %v74_v19  ;;  %v80_v34 = vshrl.u32 %v278_v33, %v74_v19 }
  0xa2   :  { %v83_v36 = vshrl.u32 %v273_v20, %v74_v19  ;;  %v75_v40 = vshrl.u32 %v276_v28, %v74_v19  ;;  %vm92_vm3 = vcmp.lt.s32.totalorder %v72_v18, 2  ;;  %vm93_vm4 = vcmp.lt.s32.totalorder %v72_v18, 3 }
  0xa3   :  { %v87_v37 = vor.u32 %v86_v25, %v85_v21  ;;  %v90_v38 = vor.u32 %v89_v27, %v88_v23  ;;  %v78_v39 = vor.u32 %v77_v31, %v76_v29  ;;  %v81_v41 = vor.u32 %v80_v34, %v79_v32 }
  0xa4   :  { %v84_v42 = vor.u32 %v83_v36, %v82_v35 }
  0xa5   :  { %v100_v43 = vsel %vm94_vm1, %v87_v37, 920167782  ;;  %v104_v44 = vsel %vm94_vm1, %v90_v38, 1326507024  ;;  %v99_v46 = vsel %vm91_vm2, %v78_v39, %v81_v41  ;;  %v95_v49 = vsel %vm91_vm2, %v75_v40, %v78_v39  ;;  %v175_v38 = vld [vmem:[#allocation3 + $0x8] sm:$0xff]  ;;  %v171_v39 = vpop.permute.xlu0 %170 }
  0xa6   :  { %v96_v45 = vsel %vm94_vm1, %v84_v42, 2102212464  ;;  %v101_v47 = vsel %vm93_vm4, %v84_v42, %v100_v43  ;;  %v103_v48 = vsel %vm91_vm2, %v81_v41, %v84_v42  ;;  %v105_v52 = vsel %vm93_vm4, %v87_v37, %v104_v44  ;;  %v174_v37 = vld [vmem:[#allocation3] sm:$0xff] }
  0xa7   :  { %v97_v50 = vsel %vm93_vm4, %v81_v41, %v96_v45  ;;  %v102_v51 = vsel %vm92_vm3, %v99_v46, %v101_v47  ;;  %v106_v53 = vsel %vm92_vm3, %v103_v48, %v105_v52 }
  0xa8   :  { %v334_v54 = vmul.u32.u64.low %v107_v24, %v102_v51  ;;  %v335_v55 = vmul.u32.u64.high %v107_v24, %v102_v51, %v334_v54  ;;  %v337_v56 = vmul.u32.u64.low %v107_v24, %v106_v53  ;;  %v338_v57 = vmul.u32.u64.high %v107_v24, %v106_v53, %v337_v56 }
  0xa9   :  { %v98_v58 = vsel %vm92_vm3, %v95_v49, %v97_v50 }
  0xaa   :  { %v117_v59 = vadd.s32 1, %v335_v55  ;;  %v114_v60 = vmul.u32 %v107_v24, %v98_v58  ;;  %vm116_vm5 = vc.u32 %v338_v57, %v334_v54  ;;  %v115_v9 = vadd.s32 %v334_v54, %v338_v57 }
  0xac   :  { %v118_v61 = vsel %vm116_vm5, %v117_v59, %v335_v55 }
  0xad   :  { %v119_v62 = vadd.s32 %v118_v61, %v114_v60 }
  0xaf   :  { %v120_v63 = vadd.s32 536870912, %v119_v62 }
  0xb1   :  { %v121_v0 = vshrl.u32 %v120_v63, 30 }
  0xb3   :  { %v122_v1 = vshll.u32 %v121_v0, 30  ;;  %v145_v23 = vsub.s32 4, %v121_v0 }
  0xb5   :  { %v123_v2 = vsub.s32 %v119_v62, %v122_v1  ;;  %v146_v26 = vsel %vm61_vm7, %v145_v23, %v121_v0 }
  0xb6   :  { %v148_v27 = vsel %vm60_vm8, 0, %v146_v26 }
  0xb7   :  { %v125_v3 = vsub.s32 0, %v123_v2  ;;  %v152_v28 = vadd.s32 3, %v148_v27 }
  0xb9   :  { %v201_v4 = vmin.u32 %v125_v3, %v123_v2  ;;  %v153_v29 = vand.u32 3, %v152_v28 }
  0xbb   :  { %v127_v5 = vclz %v201_v4  ;;  %vm158_vm9 = vcmp.eq.s32.totalorder %v153_v29, 2  ;;  %vm155_vm10 = vcmp.eq.s32.totalorder %v153_v29, 0  ;;  %vm154_vm11 = vcmp.lt.s32.totalorder %v153_v29, 2 }
  0xbd   :  { %v202_v6 = vadd.s32 4294967294, %v127_v5 }
  0xbf   :  { %vm203_vm6 = vcmp.lt.s32.totalorder %v202_v6, 0 }
  0xc0   :  { %v130_v7 = vsel %vm203_vm6, 0, %v202_v6 }
  0xc1   :  { %v131_v11 = vsub.s32 32, %v130_v7  ;;  %v135_v12 = vsub.s32 4294967266, %v130_v7  ;;  %v132_v13 = vshll.u32 %v123_v2, %v130_v7 }
  0xc3   :  { %v133_v14 = vshrl.u32 %v115_v9, %v131_v11  ;;  %v136_v15 = vadd.s32 127, %v135_v12 }
  0xc5   :  { %v134_v16 = vor.u32 %v133_v14, %v132_v13  ;;  %v137_v17 = vshll.u32 %v136_v15, 23 }
  0xc7   :  { %v138_v18 = vor.u32 4788187, %v137_v17  ;;  %v141_v20 = vcvt.s32.f32 %v134_v16 }
  0xc9   :  { %v139_v19 = vand.u32 2147483647, %v138_v18 }
  0xcb   :  { %v142_v21 = vmul.f32 %v141_v20, %v139_v19 }
  0xcd   :  { %v143_v22 = vxor.u32 2147483648, %v142_v21 }
  0xcf   :  { %v144_v24 = vsel %vm61_vm7, %v143_v22, %v142_v21 }
  0xd0   :  { %v147_v25 = vsel %vm60_vm8, %v328_v8, %v144_v24 }
  0xd1   :  { %221 = vcosq.f32 %v147_v25 }
  0xd2   :  { %223 = vsinq.f32 %v147_v25 }
  0xde   :  { %v222_v30 = vpop.eup %221 }
  0xdf   :  { %v224_v31 = vpop.eup %223  ;;  %v159_v32 = vxor.u32 2147483648, %v222_v30 }
  0xe0   :  { %v156_v33 = vxor.u32 2147483648, %v224_v31 }
  0xe1   :  { %v160_v34 = vsel %vm158_vm9, %v159_v32, %v224_v31 }
  0xe2   :  { %v157_v35 = vsel %vm155_vm10, %v222_v30, %v156_v33 }
  0xe3   :  { %v161_v10 = vsel %vm154_vm11, %v157_v35, %v160_v34 }
  0xe4   :  { %v162_v36 = vsel %vm151_vm12, nan, %v161_v10 }
  0xe5   :  { %v173_v40 = vmul.f32 %v171_v39, %v162_v36 }
  0xe7   :  { %v176_v41 = vadd.f32 %v174_v37, %v173_v40  ;;  %v177_v42 = vadd.f32 %v175_v38, %v173_v40 }
  0xe9   :  { %179 = vst.msk [vmem:[#allocation6] sm:$0xff] %vm178_vm13, %v176_v41  ;;  %180 = vst.msk [vmem:[#allocation6 + $0x8] sm:$0xff] %vm178_vm13, %v177_v42 }
  0xea   :  { %256 = shalt.err (!%p253_p9)
}
  0xeb   :  { %192 = dma.vmem_to_hbm [thread:$0]  %s187_s1, 256, %s360_s5, [#allocation5], %s270_s23, %s270_s23, %s271_s24  }
  0xec   :  { %267 = dma.done.wait [#allocation5], 256  }
  0xed   :  { %268 = vsyncadd [#allocation5], 4294967040 }
  0xee   :  { %196 = vsyncpa [#allocation4], 1 }
  0xef   :  { %197 = vsyncpa [#allocation5], 1 }

</bundles_post_ra>
